<compile_context>
chip_gen: v7x
topology: tpu7x:2x2x1
jax: 0.10.0
libtpu: 0.0.40
codegen_flags: <defaults>
</compile_context>

<pallas_src>
import numpy as np
import jax
import jax.numpy as jnp
from jax.experimental import pallas as pl
from jax.experimental.pallas import tpu as pltpu


# ----------------------------------------------------------------------------
# Deterministic parameter construction (matches the torch module's __init__).
# ----------------------------------------------------------------------------
def blackmanharris(N):
    a0, a1, a2, a3 = 0.35875, 0.48829, 0.14128, 0.01168
    n = np.arange(N, dtype=np.float64)
    fac = 2.0 * np.pi * n / (N - 1)
    w = a0 - a1 * np.cos(fac) + a2 * np.cos(2.0 * fac) - a3 * np.cos(3.0 * fac)
    return w.astype(np.float32)


def _hz_to_mel(f):
    f = np.asarray(f, dtype=np.float64)
    f_sp = 200.0 / 3.0
    mels = f / f_sp
    min_log_hz = 1000.0
    min_log_mel = min_log_hz / f_sp
    logstep = np.log(6.4) / 27.0
    return np.where(f >= min_log_hz,
                    min_log_mel + np.log(np.maximum(f, 1e-10) / min_log_hz) / logstep,
                    mels)


def _mel_to_hz(m):
    m = np.asarray(m, dtype=np.float64)
    f_sp = 200.0 / 3.0
    freqs = m * f_sp
    min_log_hz = 1000.0
    min_log_mel = min_log_hz / f_sp
    logstep = np.log(6.4) / 27.0
    return np.where(m >= min_log_mel,
                    min_log_hz * np.exp(logstep * (m - min_log_mel)),
                    freqs)


def create_mel_filterbank(sr, n_fft, n_mels):
    """Slaney-style mel filterbank (librosa.filters.mel defaults), shape [n_mels, n_fft//2+1]."""
    n_freqs = n_fft // 2 + 1
    fftfreqs = np.linspace(0.0, sr / 2.0, n_freqs)
    mel_pts = np.linspace(_hz_to_mel(0.0), _hz_to_mel(sr / 2.0), n_mels + 2)
    hz_pts = _mel_to_hz(mel_pts)
    fdiff = np.diff(hz_pts)
    ramps = hz_pts.reshape(-1, 1) - fftfreqs.reshape(1, -1)
    weights = np.zeros((n_mels, n_freqs), dtype=np.float64)
    for i in range(n_mels):
        lower = -ramps[i] / fdiff[i]
        upper = ramps[i + 2] / fdiff[i + 1]
        weights[i] = np.maximum(0.0, np.minimum(lower, upper))
    enorm = 2.0 / (hz_pts[2:n_mels + 2] - hz_pts[:n_mels])
    weights *= enorm[:, None]
    return weights.astype(np.float32)


def _round_up(x, m):
    return ((x + m - 1) // m) * m


def build_fused_operands(window_size, sampling_rate, n_mels):
    """Window-folded fused DFT matrix (2*F_pad, W) and duplicated mel matrix (M, 2*F_pad)."""
    win = blackmanharris(window_size).astype(np.float64)             # (W,)
    F_bins = window_size // 2 + 1
    F_pad = _round_up(F_bins, 128)

    w_idx = np.arange(window_size, dtype=np.float64)[None, :]        # (1, W)
    k_idx = np.arange(F_bins, dtype=np.float64)[:, None]             # (F, 1)
    ang = 2.0 * np.pi * w_idx * k_idx / window_size                  # (F, W)
    cos_w = np.cos(ang) * win[None, :]                               # window folded in
    sin_w = -np.sin(ang) * win[None, :]

    dft = np.zeros((2 * F_pad, window_size), dtype=np.float32)
    dft[:F_bins, :] = cos_w
    dft[F_pad:F_pad + F_bins, :] = sin_w

    mel_fb = create_mel_filterbank(sampling_rate, window_size, n_mels)  # (M, F)
    mel_pad = np.zeros((n_mels, F_pad), dtype=np.float32)
    mel_pad[:, :F_bins] = mel_fb
    mel2 = np.concatenate([mel_pad, mel_pad], axis=1)                # (M, 2*F_pad)

    return jnp.asarray(dft), jnp.asarray(mel2), jnp.asarray(mel_fb)


# ----------------------------------------------------------------------------
# Pallas kernel: fused window+rDFT matmul, |.|^2, mel projection — all on MXU.
# ----------------------------------------------------------------------------
def mel_fft_kernel(framesT_ref, dft_ref, mel2_ref, out_ref):
    # framesT_ref: (W, TT)        window samples on sublanes, frame idx on lanes
    # dft_ref:     (2*F_pad, W)   [win*cos ; -win*sin], zero-padded freq rows
    # mel2_ref:    (M, 2*F_pad)   [mel_fb_pad | mel_fb_pad]
    # out_ref:     (M, TT)        lane-dense mel output
    y = jnp.dot(dft_ref[...], framesT_ref[...],
                preferred_element_type=jnp.float32)                  # (2F_pad, TT)
    sq = y * y                                                       # re^2 and im^2 rows
    out_ref[...] = jnp.dot(mel2_ref[...], sq,
                           preferred_element_type=jnp.float32)       # (M, TT) == mel_fb @ |rfft|^2


def mel_spectrogram_pallas(framesT, dft, mel2, tile_t):
    B, W, T_pad = framesT.shape
    F2 = dft.shape[0]
    M = mel2.shape[0]
    assert T_pad % tile_t == 0
    grid = (B, T_pad // tile_t)
    return pl.pallas_call(
        mel_fft_kernel,
        out_shape=jax.ShapeDtypeStruct((B, M, T_pad), jnp.float32),
        grid=grid,
        in_specs=[
            pl.BlockSpec((None, W, tile_t), lambda b, t: (b, 0, t)),   # frames (transposed)
            pl.BlockSpec((F2, W), lambda b, t: (0, 0)),                # fused windowed DFT
            pl.BlockSpec((M, F2), lambda b, t: (0, 0)),                # duplicated mel fb
        ],
        out_specs=pl.BlockSpec((None, M, tile_t), lambda b, t: (b, 0, t)),
        compiler_params=pltpu.CompilerParams(
            dimension_semantics=("parallel", "parallel")),
    )(framesT, dft, mel2)


# ----------------------------------------------------------------------------
# Forward pass (glue: framing into (W, T) layout, padding, final reshape).
# ----------------------------------------------------------------------------
def frame_signal_T(x, window_size, hop_size):
    """Frame a 1-D signal into (W, num_frames)."""
    n = x.shape[0]
    if n < window_size:
        x = jnp.pad(x, (0, window_size - n))
        n = window_size
    num_frames = (n - window_size) // hop_size + 1
    idx = (np.arange(window_size)[:, None]
           + np.arange(num_frames)[None, :] * hop_size)              # (W, T)
    return x[idx]


def sliding_window_mel_fft(signal_list, window_size, hop_size,
                           sampling_rate=44100, n_mels=8, tile_t=512):
    dft, mel2, _ = build_fused_operands(window_size, sampling_rate, n_mels)

    frames_list = [frame_signal_T(jnp.asarray(s, jnp.float32), window_size, hop_size)
                   for s in signal_list]
    lengths = [f.shape[1] for f in frames_list]
    T_max = max(lengths)

    # Lane-aligned time tile; keep it no larger than needed so small inputs
    # don't over-pad, but always a multiple of 128 for dense stores.
    tile_t = max(128, min(tile_t, _round_up(T_max, 128)))
    T_pad = _round_up(T_max, tile_t)

    framesT = jnp.stack(
        [jnp.pad(f, ((0, 0), (0, T_pad - f.shape[1]))) for f in frames_list], axis=0)

    mel = mel_spectrogram_pallas(framesT, dft, mel2, tile_t)          # (B, M, T_pad)
    mel = mel[:, :, :T_max]                                           # (B, M, T_max)
    return mel[:, None, :, :]                                         # (B, 1, M, T_max)


# ----------------------------------------------------------------------------
# Pure-JAX reference (mirrors the torch forward with jnp.fft.rfft).
# ----------------------------------------------------------------------------
def reference_forward(signal_list, window_size, hop_size, sampling_rate=44100, n_mels=8):
    window = jnp.asarray(blackmanharris(window_size)).reshape(1, -1)
    mel_fb = jnp.asarray(create_mel_filterbank(sampling_rate, window_size, n_mels))
    specs, lengths = [], []
    for s in signal_list:
        framesT = frame_signal_T(jnp.asarray(s, jnp.float32), window_size, hop_size)
        frames = framesT.T                                            # (T, W)
        windowed = frames * window
        fft_vals = jnp.fft.rfft(windowed, axis=-1)
        power = jnp.abs(fft_vals) ** 2
        mel_spec = (power @ mel_fb.T).T                               # (M, T)
        specs.append(mel_spec)
        lengths.append(mel_spec.shape[1])
    T_max = max(lengths)
    padded = [jnp.pad(sp, ((0, 0), (0, T_max - sp.shape[1]))) for sp in specs]
    return jnp.stack(padded, axis=0)[:, None, :, :]                   # (B, 1, M, T_max)


if __name__ == "__main__":
    window_size, hop_size, n_mels, sr = 128, 64, 8, 44100

    key = jax.random.PRNGKey(0)
    k0, k1 = jax.random.split(key)
    sig0 = jax.random.normal(k0, (1024,), dtype=jnp.float32)   # -> 15 frames
    sig1 = jax.random.normal(k1, (768,), dtype=jnp.float32)    # -> 11 frames (padded to 15)
    signal_list = [sig0, sig1]

    out = sliding_window_mel_fft(signal_list, window_size, hop_size, sr, n_mels)
    out = jax.block_until_ready(out)

    ref = jax.block_until_ready(
        reference_forward(signal_list, window_size, hop_size, sr, n_mels))

    assert out.shape == ref.shape == (2, 1, n_mels, 15), (out.shape, ref.shape)
    np.testing.assert_allclose(np.asarray(out), np.asarray(ref), rtol=1e-3, atol=1e-2)
    print("KERNEL_OK")
</pallas_src>

<mosaic_0001>
module attributes {stable_mosaic.version = 11 : i64} {
  func.func @mel_fft_kernel(%arg0: i32, %arg1: i32, %arg2: memref<1x128x128xf32, #tpu.memory_space<vmem>>, %arg3: memref<256x128xf32, #tpu.memory_space<vmem>>, %arg4: memref<8x256xf32, #tpu.memory_space<vmem>>, %arg5: memref<1x8x128xf32, #tpu.memory_space<vmem>>) attributes {dimension_semantics = [#tpu.dimension_semantics<parallel>, #tpu.dimension_semantics<parallel>], iteration_bounds = array<i64: 2, 1>, scalar_prefetch = 0 : i64, scratch_operands = 0 : i64, tpu.core_type = #tpu.core_type<tc>, window_params = [{transform_indices = @transform_0, window_bounds = array<i64: 1, 128, 128>}, {pipeline_mode = #tpu.pipeline_mode<synchronous>, transform_indices = @transform_1, window_bounds = array<i64: 256, 128>}, {pipeline_mode = #tpu.pipeline_mode<synchronous>, transform_indices = @transform_2, window_bounds = array<i64: 8, 256>}, {transform_indices = @transform_3, window_bounds = array<i64: 1, 8, 128>}]} {
    %c0 = arith.constant 0 : index
    %c0_0 = arith.constant 0 : index
    %0 = vector.load %arg3[%c0, %c0_0] : memref<256x128xf32, #tpu.memory_space<vmem>>, vector<256x128xf32>
    %c0_1 = arith.constant 0 : index
    %c0_2 = arith.constant 0 : index
    %c0_3 = arith.constant 0 : index
    %1 = vector.load %arg2[%c0_1, %c0_2, %c0_3] : memref<1x128x128xf32, #tpu.memory_space<vmem>>, vector<1x128x128xf32>
    %2 = vector.shape_cast %1 : vector<1x128x128xf32> to vector<128x128xf32>
    %cst = arith.constant dense<0.000000e+00> : vector<256x128xf32>
    %3 = tpu.matmul %0, %2, %cst {dimension_numbers = #tpu.dot_dimension_numbers<[1], [0], [0], [1], [0, 0, 1, 1], [], []>} : vector<256x128xf32>, vector<128x128xf32>, vector<256x128xf32> -> vector<256x128xf32>
    %4 = arith.mulf %3, %3 : vector<256x128xf32>
    %c0_4 = arith.constant 0 : index
    %c0_5 = arith.constant 0 : index
    %5 = vector.load %arg4[%c0_4, %c0_5] : memref<8x256xf32, #tpu.memory_space<vmem>>, vector<8x256xf32>
    %cst_6 = arith.constant dense<0.000000e+00> : vector<8x128xf32>
    %6 = tpu.matmul %5, %4, %cst_6 {dimension_numbers = #tpu.dot_dimension_numbers<[1], [0], [0], [1], [0, 0, 1, 1], [], []>} : vector<8x256xf32>, vector<256x128xf32>, vector<8x128xf32> -> vector<8x128xf32>
    %c0_7 = arith.constant 0 : index
    %c0_8 = arith.constant 0 : index
    %c0_9 = arith.constant 0 : index
    %7 = vector.load %arg5[%c0_7, %c0_8, %c0_9] : memref<1x8x128xf32, #tpu.memory_space<vmem>>, vector<1x8x128xf32>
    %8 = vector.shape_cast %7 : vector<1x8x128xf32> to vector<8x128xf32>
    %9 = vector.shape_cast %6 : vector<8x128xf32> to vector<1x8x128xf32>
    tpu.vector_store %arg5[%c0_7, %c0_8, %c0_9], %9 {strides = array<i32>} : memref<1x8x128xf32, #tpu.memory_space<vmem>>, vector<1x8x128xf32>,
    return
  }
  func.func @transform_0(%arg0: i32, %arg1: i32) -> (i32, i32, i32) {
    %c0_i32 = arith.constant 0 : i32
    %c0_i32_0 = arith.constant 0 : i32
    return %arg0, %c0_i32, %arg1 : i32, i32, i32
  }
  func.func @transform_1(%arg0: i32, %arg1: i32) -> (i32, i32) {
    %c0_i32 = arith.constant 0 : i32
    %c0_i32_0 = arith.constant 0 : i32
    %c0_i32_1 = arith.constant 0 : i32
    return %c0_i32, %c0_i32_0 : i32, i32
  }
  func.func @transform_2(%arg0: i32, %arg1: i32) -> (i32, i32) {
    %c0_i32 = arith.constant 0 : i32
    %c0_i32_0 = arith.constant 0 : i32
    %c0_i32_1 = arith.constant 0 : i32
    return %c0_i32, %c0_i32_0 : i32, i32
  }
  func.func @transform_3(%arg0: i32, %arg1: i32) -> (i32, i32, i32) {
    %c0_i32 = arith.constant 0 : i32
    %c0_i32_0 = arith.constant 0 : i32
    return %arg0, %c0_i32, %arg1 : i32, i32, i32
  }
}

</mosaic_0001>

<bundles_post_ra>
// kernel: tpu_custom_call.1
= control target key start
LH: loop header
LB: loop body
LE: loop exit
PB: predicated region body
PF: predicated region fallthrough
CT: control target
= control target key end

     0   :  { %8 = vsyncpa [#allocation3], 0  ;;  %s1535_s0 = inlined_call_operand.hbm [shape: f32[2,128,128], index: 0, kind: input, shape index: {}]   ;;  %s1536_s1 = inlined_call_operand.hbm [shape: f32[256,128], index: 1, kind: input, shape index: {}]   ;;  %s1537_s2 = inlined_call_operand.hbm [shape: f32[8,256], index: 2, kind: input, shape index: {}]   ;;  %s1538_s3 = inlined_call_operand.hbm [shape: f32[2,8,128], index: 3, kind: output, shape index: {}]  }
   0x1   :  { %10 = vsyncpa [#allocation3 + $0x1], 0 }
   0x2   :  { %11 = vsyncpa [#allocation6], 0 }
   0x3   :  { %12 = vsyncpa [#allocation4], 0 }
   0x4   :  { %14 = vsyncpa [#allocation4 + $0x1], 0  ;;  %s1257_s12 = smov 0   ;;  %s1259_s13 = smov 0  }
   0x5   :  { %s1261_s14 = smov 0   ;;  %s1263_s15 = smov 0  }
   0x6   :  { %s1265_s16 = smov 0   ;;  %s1267_s17 = smov 0  }
   0x7 LB: > { %s726_s18 = sadd.s32 4294967295, %s1229_s17   ;;  %s727_s19 = sadd.s32 4294967294, %s1229_s17   ;;  %s1229_s17 = sphi %s1267_s17, %s20_s17   ;;  %s1225_s16 = sphi %s1265_s16, %s1560_s16   ;;  %s1221_s15 = sphi %s1263_s15, %s1559_s15   ;;  %s1217_s14 = sphi %s1261_s14, %s1558_s14   ;;  %s1213_s13 = sphi %s1259_s13, %s1557_s13   ;;  %s1209_s12 = sphi %s1257_s12, %s1556_s12  }
   0x8   : > { %p54_p0 = scmp.ne.s32.totalorder %s1213_s13, %s1209_s12  ;;  %p1291_p1 = scmp.eq.s32.totalorder %s726_s18, 0 }
   0x9   : > { %p1295_p2 = scmp.eq.s32.totalorder %s726_s18, 1  ;;  %p128_p3 = scmp.eq.s32.totalorder %s727_s19, 1 }
   0xa   : > { %s1543_s20 = scalar_select %p1291_p1, 1, 0 }
   0xb   : > { %p1301_p4 = por %p1291_p1, %p54_p0  ;;  %p728_p5 = scmp.ge.s32.totalorder %s1229_s17, 1 }
   0xc   : > { %p1306_p6 = por %p128_p3, %p54_p0  ;;  %p135_p7 = scmp.lt.s32.totalorder %s1229_s17, 3 }
   0xd   : > { %s1545_s22 = scalar_select %p1301_p4, 1, 0 }
   0xe   : > { %s1546_s23 = scalar_select %p1306_p6, 1, 0 }
   0xf   : > { %p1311_p8 = pnand %p728_p5, %p135_p7  ;;  %s1231_s25 = smov [#allocation5]  }
  0x10   : > { %s147_s26 = sshll.u32 %s1231_s25, 4  ;;  %s1232_s28 = smov [#allocation7]   ;;  %s1315_s26 = int_to_ptr.vmem [resolvable:$true] %s147_s26 }
  0x11   : > { %p984_p9 = pneg %p1311_p8  ;;  %s161_s29 = sshll.u32 %s1232_s28, 4  ;;  %s1326_s29 = int_to_ptr.vmem [resolvable:$true] %s161_s29 }
  0x12   : > { %s1057_s5 = scalar_lea.hbm %s1536_s1, 4096 }
  0x13   : > { %p1322_p11 = pnand %p984_p9, %p1291_p1  ;;  %p1058_p12 = scmp.ne.s32.totalorder %s1536_s1, %s1057_s5 }
  0x14   : > { %p1064_p5 = scmp.lt.u32.totalorder %s1057_s5, %s1536_s1 }
  0x15   : > { %p1059_p13 = pneg %p1322_p11 }
  0x17   : > { %p1060_p0 = pnand %p1059_p13, %p1058_p12 }
  0x19   : > { %p1061_p3 = pneg %p1060_p0 }
  0x1b   : > { %p1066_p7 = pnand %p1064_p5, %p1061_p3 }
  0x1d   : > { %1069 = shalt.err (!%p1066_p7)
}
  0x1e   : > { %s1070_s10 = scalar_lea.vmem %s1315_s26, 4096  ;;  %p1078_p1 = scmp.lt.s32.totalorder %s1315_s26, %s1315_s26 }
  0x1f   : > { %p1071_p9 = scmp.ne.s32.totalorder %s1315_s26, %s1070_s10  ;;  %p1079_p12 = scmp.lt.s32.totalorder %s1070_s10, %s1070_s10 }
  0x21   : > { %p1073_p10 = pnand %p1071_p9, %p1059_p13  ;;  %p1080_p0 = por %p1079_p12, %p1078_p1 }
  0x23   : > { %p1074_p6 = pneg %p1073_p10 }
  0x25   : > { %p1081_p4 = pnand %p1080_p0, %p1074_p6 }
  0x27   : > { %1084 = shalt.err (!%p1081_p4)
}
  0x28   : > { %s1233_s11 = smov 128   ;;  %s1234_s18 = smov 8  }
  0x29   : > { %987 = dma.hbm_to_vmem [thread:$0]  (!%p1322_p11), %s1536_s1, 4096, %s1315_s26, [#allocation6], %s1233_s11, %s1233_s11, %s1234_s18  }
  0x2a   : > { %s1085_s4 = scalar_lea.hbm %s1537_s2, 256 }
  0x2b   : > { %p1086_p1 = scmp.ne.s32.totalorder %s1537_s2, %s1085_s4  ;;  %p1092_p10 = scmp.lt.u32.totalorder %s1085_s4, %s1537_s2 }
  0x2d   : > { %p1088_p4 = pnand %p1086_p1, %p1059_p13 }
  0x2f   : > { %p1089_p6 = pneg %p1088_p4 }
  0x31   : > { %p1094_p3 = pnand %p1092_p10, %p1089_p6 }
  0x33   : > { %1097 = shalt.err (!%p1094_p3)
}
  0x34   : > { %s1098_s26 = scalar_lea.vmem %s1326_s29, 256  ;;  %p1106_p12 = scmp.lt.s32.totalorder %s1326_s29, %s1326_s29 }
  0x35   : > { %p1099_p5 = scmp.ne.s32.totalorder %s1326_s29, %s1098_s26  ;;  %p1107_p0 = scmp.lt.s32.totalorder %s1098_s26, %s1098_s26 }
  0x37   : > { %p1101_p7 = pnand %p1099_p5, %p1059_p13  ;;  %p1108_p1 = por %p1107_p0, %p1106_p12 }
  0x39   : > { %p1102_p9 = pneg %p1101_p7 }
  0x3b   : > { %p1109_p4 = pnand %p1108_p1, %p1102_p9 }
  0x3d   : > { %1112 = shalt.err (!%p1109_p4)
}
  0x3e   : > { %990 = dma.hbm_to_vmem [thread:$0]  (!%p1322_p11), %s1537_s2, 256, %s1326_s29, [#allocation6]  }
  0x3f   : > { %s32_s19 = sadd.s32 1, %s1225_s16  ;;  %s41_s25 = sadd.s32 1, %s1217_s14 }
  0x40   : > { %p34_p13 = scmp.ge.s32.totalorder %s32_s19, 2  ;;  %p48_p6 = scmp.ne.s32.totalorder %s1217_s14, %s1213_s13 }
  0x41   : > { %p49_p10 = scmp.eq.s32.totalorder %s1229_s17, 0  ;;  %p1001_p3 = scmp.lt.s32.totalorder %s1229_s17, 2 }
  0x42   : > { %s1562_s19 = smov (%p34_p13, %s32_s19), 0  ;;  %p1393_p7 = por %p1295_p2, %p48_p6 }
  0x43   : > { %p50_p5 = por %p49_p10, %p48_p6  ;;  %s36_s28 = ssub.s32 %s1225_s16, %s1562_s19 }
  0x44   : > { %s1549_s27 = scalar_select %p1393_p7, 1, 0 }
  0x45   : > { %s172_s30 = sand.u32 1, %s1217_s14   ;;  %p39_p9 = scmp.eq.s32.totalorder %s36_s28, 0 }
  0x46   : > { %s732_s29 = sshll.u32 %s172_s30, 7  ;;  %s744_s4 = sshll.u32 %s1225_s16, 11 }
  0x47   : > { %s1402_s5 = scalar_select %p39_p9, %s1217_s14, %s41_s25  }
  0x48   : > { %s1407_s8 = scalar_lea.hbm %s1535_s0, %s744_s4  ;;  %s176_s21 = scalar_lea.vmem [#allocation2], %s732_s29 }
  0x49   : > { %s184_s26 = sshll.u32 %s176_s21, 4  ;;  %p1411_p2 = pnand %p1001_p3, %p50_p5  ;;  %s1415_s26 = int_to_ptr.vmem [resolvable:$true] %s184_s26 }
  0x4a   : > { %s1417_s10 = scalar_lea.sflag [#allocation3], %s172_s30  ;;  %s1113_s25 = scalar_lea.hbm %s1407_s8, 2048 }
  0x4b   : > { %p1114_p11 = scmp.ne.s32.totalorder %s1407_s8, %s1113_s25  ;;  %p1115_p12 = pneg %p1411_p2 }
  0x4c   : > { %s1118_s4 = scalar_lea.hbm %s1535_s0, 4096  ;;  %p1119_p4 = scmp.lt.u32.totalorder %s1407_s8, %s1535_s0 }
  0x4d   : > { %p1116_p0 = pnand %p1115_p12, %p1114_p11  ;;  %p1120_p13 = scmp.lt.u32.totalorder %s1118_s4, %s1113_s25 }
  0x4e   : > { %p1122_p10 = scmp.lt.u32.totalorder %s1113_s25, %s1407_s8 }
  0x4f   : > { %p1117_p1 = pneg %p1116_p0  ;;  %p1121_p6 = por %p1120_p13, %p1119_p4 }
  0x51   : > { %p1123_p3 = por %p1122_p10, %p1121_p6 }
  0x53   : > { %p1124_p5 = pnand %p1123_p3, %p1117_p1 }
  0x55   : > { %1127 = shalt.err (!%p1124_p5)
}
  0x56   : > { %s1128_s30 = scalar_lea.vmem %s1415_s26, 2048  ;;  %s1235_s21 = smov [#allocation2]  }
  0x57   : > { %p1129_p9 = scmp.ne.s32.totalorder %s1415_s26, %s1128_s30  ;;  %s1133_s28 = sshll.u32 %s1235_s21, 4  ;;  %s1134_s28 = int_to_ptr.vmem [resolvable:$false] %s1133_s28 }
  0x58   : > { %s1135_s29 = scalar_lea.vmem %s1134_s28, 4096  ;;  %p1136_p7 = scmp.lt.s32.totalorder %s1415_s26, %s1134_s28 }
  0x59   : > { %p1131_p11 = pnand %p1129_p9, %p1115_p12  ;;  %p1137_p4 = scmp.lt.s32.totalorder %s1135_s29, %s1128_s30 }
  0x5b   : > { %p1132_p0 = pneg %p1131_p11  ;;  %p1138_p13 = por %p1137_p4, %p1136_p7 }
  0x5d   : > { %p1139_p6 = pnand %p1138_p13, %p1132_p0 }
  0x5f   : > { %1142 = shalt.err (!%p1139_p6)
}
  0x60   : > { %994 = dma.hbm_to_vmem [thread:$0]  (!%p1411_p2), %s1407_s8, 2048, %s1415_s26, %s1417_s10, %s1233_s11, %s1233_s11, %s1234_s18  }
  0x61   : > { %196 = sbr.rel (%p1311_p8) target bundleno = 653 (0x28d), region = 32  ;;  %s1451_s25 = sand.u32 (!%p1311_p8), 1, %s1213_s13  }
  0x62   : > { %s736_s4 = sshll.u32 (!%p1311_p8), %s1451_s25, 7  ;;  %s199_s6 = scalar_lea.sflag (!%p1311_p8), [#allocation3], %s1451_s25 }
  0x63   : > { %s1455_s7 = scalar_lea.vmem (!%p1311_p8), [#allocation2], %s736_s4  ;;  %p1551_p7 = scmp.ne.s32.totalorder (!%p1311_p8), %s1545_s22, 0 }
  0x68   : > { %1196 = dma.done.wait (%p1551_p7), %s199_s6, 2048  }
  0x69   : > { %1198 = vsyncadd (%p1551_p7), %s199_s6, 4294965248  ;;  %p1552_p2 = scmp.ne.s32.totalorder %s1543_s20, 0 }
  0x6b   : > { %1200 = dma.done.wait (%p1552_p2), [#allocation6], 4352  }
  0x6c   : > { %1202 = vsyncadd (%p1552_p2), [#allocation6], 4294962944  ;;  %v265_v0 = vld [vmem:[%s1455_s7] sm:$0xff]  ;;  %v266_v1 = vld [vmem:[%s1455_s7 + $0x8] sm:$0xff]  ;;  %s739_s20 = sshll.u32 %s1451_s25, 3  ;;  %s741_s22 = sshll.u32 %s1221_s15, 7 }
  0x6d   : > { %v267_v2 = vld [vmem:[%s1455_s7 + $0x10] sm:$0xff]  ;;  %v908_v3 = vpack.c.bf16 %v266_v1, %v265_v0  ;;  %v268_v4 = vld [vmem:[%s1455_s7 + $0x18] sm:$0xff]  ;;  %v269_v6 = vld [vmem:[%s1455_s7 + $0x20] sm:$0xff]  ;;  %s232_s24 = scalar_lea.vmem [#allocation8], %s739_s20  ;;  %s1486_s26 = scalar_lea.hbm %s1538_s3, %s741_s22 }
  0x6e   : > { %v912_v5 = vpack.c.bf16 %v268_v4, %v267_v2  ;;  %v270_v7 = vld [vmem:[%s1455_s7 + $0x28] sm:$0xff]  ;;  %v233_v9 = vld [vmem:[#allocation5] sm:$0xff]  ;;  %v271_v10 = vld [vmem:[%s1455_s7 + $0x30] sm:$0xff]  ;;  %s626_s11 = sshll.u32 %s232_s24, 4  ;;  %s612_s9 = scalar_lea.sflag [#allocation4], %s1451_s25  ;;  %s1488_s11 = int_to_ptr.vmem [resolvable:$true] %s626_s11 }
  0x6f   : > { %909 = vmatprep.subr.bf16.mxu0 %v908_v3  ;;  %v916_v8 = vpack.c.bf16 %v270_v7, %v269_v6  ;;  %v272_v11 = vld [vmem:[%s1455_s7 + $0x38] sm:$0xff]  ;;  %860 = vmatprep.mubr.f32.mxu0 %v233_v9  ;;  %v273_v13 = vld [vmem:[%s1455_s7 + $0x40] sm:$0xff]  ;;  %v274_v14 = vld [vmem:[%s1455_s7 + $0x48] sm:$0xff]  ;;  %s1143_s10 = scalar_lea.vmem %s1488_s11, 128  ;;  %p1553_p12 = scmp.ne.s32.totalorder %s1549_s27, 0 }
  0x70   : > { %911 = vmatpush3.bf16.msra.mxu0 %v908_v3  ;;  %v920_v12 = vpack.c.bf16 %v272_v11, %v271_v10  ;;  %v924_v15 = vpack.c.bf16 %v274_v14, %v273_v13  ;;  %v275_v16 = vld [vmem:[%s1455_s7 + $0x50] sm:$0xff]  ;;  %v276_v17 = vld [vmem:[%s1455_s7 + $0x58] sm:$0xff]  ;;  %v277_v19 = vld [vmem:[%s1455_s7 + $0x60] sm:$0xff]  ;;  %p1144_p8 = scmp.ne.s32.totalorder %s1488_s11, %s1143_s10  ;;  %s1236_s15 = smov [#allocation8]  }
  0x71   : > { %913 = vmatprep.subr.bf16.mxu0 %v912_v5  ;;  %v928_v18 = vpack.c.bf16 %v276_v17, %v275_v16  ;;  %v278_v20 = vld [vmem:[%s1455_s7 + $0x68] sm:$0xff]  ;;  %v279_v22 = vld [vmem:[%s1455_s7 + $0x70] sm:$0xff]  ;;  %v280_v23 = vld [vmem:[%s1455_s7 + $0x78] sm:$0xff]  ;;  %s1147_s30 = sshll.u32 %s1236_s15, 4  ;;  %s1148_s30 = int_to_ptr.vmem [resolvable:$false] %s1147_s30 }
  0x72   : > { %v932_v21 = vpack.c.bf16 %v278_v20, %v277_v19  ;;  %v936_v24 = vpack.c.bf16 %v280_v23, %v279_v22  ;;  %v234_v25 = vld [vmem:[#allocation5 + $0x8] sm:$0xff]  ;;  %v235_v26 = vld [vmem:[#allocation5 + $0x10] sm:$0xff]  ;;  %v236_v27 = vld [vmem:[#allocation5 + $0x18] sm:$0xff]  ;;  %p1145_p1 = pnand %p1144_p8, %p1553_p12  ;;  %s1149_s21 = scalar_lea.vmem %s1148_s30, 256 }
  0x73   : > { %v237_v28 = vld [vmem:[#allocation5 + $0x20] sm:$0xff]  ;;  %v238_v29 = vld [vmem:[#allocation5 + $0x28] sm:$0xff]  ;;  %v239_v30 = vld [vmem:[#allocation5 + $0x30] sm:$0xff]  ;;  %p1150_p3 = scmp.lt.s32.totalorder %s1488_s11, %s1148_s30  ;;  %p1151_p5 = scmp.lt.s32.totalorder %s1149_s21, %s1143_s10 }
  0x74   : > { %915 = vmatpush3.bf16.msra.mxu0 %v912_v5  ;;  %v240_v31 = vld [vmem:[#allocation5 + $0x38] sm:$0xff]  ;;  %v241_v32 = vld [vmem:[#allocation5 + $0x40] sm:$0xff]  ;;  %v242_v33 = vld [vmem:[#allocation5 + $0x48] sm:$0xff]  ;;  %p1146_p10 = pneg %p1145_p1 }
  0x75   : > { %917 = vmatprep.subr.bf16.mxu0 %v916_v8  ;;  %v243_v34 = vld [vmem:[#allocation5 + $0x50] sm:$0xff]  ;;  %v244_v35 = vld [vmem:[#allocation5 + $0x58] sm:$0xff]  ;;  %v245_v36 = vld [vmem:[#allocation5 + $0x60] sm:$0xff]  ;;  %p1152_p9 = por %p1151_p5, %p1150_p3 }
  0x76   : > { %v246_v37 = vld [vmem:[#allocation5 + $0x68] sm:$0xff]  ;;  %v247_v38 = vld [vmem:[#allocation5 + $0x70] sm:$0xff]  ;;  %v248_v39 = vld [vmem:[#allocation5 + $0x78] sm:$0xff] }
  0x77   : > { %v249_v40 = vld [vmem:[#allocation5 + $0x80] sm:$0xff]  ;;  %v250_v41 = vld [vmem:[#allocation5 + $0x88] sm:$0xff]  ;;  %v251_v42 = vld [vmem:[#allocation5 + $0x90] sm:$0xff]  ;;  %p1153_p11 = pnand %p1152_p9, %p1146_p10 }
  0x78   : > { %919 = vmatpush3.bf16.msra.mxu0 %v916_v8  ;;  %v252_v43 = vld [vmem:[#allocation5 + $0x98] sm:$0xff]  ;;  %v253_v44 = vld [vmem:[#allocation5 + $0xa0] sm:$0xff]  ;;  %v254_v45 = vld [vmem:[#allocation5 + $0xa8] sm:$0xff] }
  0x79   : > { %921 = vmatprep.subr.bf16.mxu0 %v920_v12  ;;  %v255_v46 = vld [vmem:[#allocation5 + $0xb0] sm:$0xff]  ;;  %v256_v47 = vld [vmem:[#allocation5 + $0xb8] sm:$0xff]  ;;  %v257_v48 = vld [vmem:[#allocation5 + $0xc0] sm:$0xff] }
  0x7a   : > { %v258_v49 = vld [vmem:[#allocation5 + $0xc8] sm:$0xff]  ;;  %v259_v50 = vld [vmem:[#allocation5 + $0xd0] sm:$0xff]  ;;  %v260_v51 = vld [vmem:[#allocation5 + $0xd8] sm:$0xff] }
  0x7b   : > { %v261_v52 = vld [vmem:[#allocation5 + $0xe0] sm:$0xff]  ;;  %v262_v53 = vld [vmem:[#allocation5 + $0xe8] sm:$0xff]  ;;  %v263_v54 = vld [vmem:[#allocation5 + $0xf0] sm:$0xff] }
  0x7c   : > { %923 = vmatpush3.bf16.msra.mxu0 %v920_v12  ;;  %v264_v55 = vld [vmem:[#allocation5 + $0xf8] sm:$0xff]  ;;  %v539_v56 = vld [vmem:[#allocation7 + $0x8] sm:$0xff] }
  0x7d   : > { %925 = vmatprep.subr.bf16.mxu0 %v924_v15  ;;  %604 = vmatprep.mubr.f32.mxu1 %v539_v56 }
  0x80   : > { %927 = vmatpush3.bf16.msra.mxu0 %v924_v15 }
  0x81   : > { %929 = vmatprep.subr.bf16.mxu0 %v928_v18 }
  0x84   : > { %931 = vmatpush3.bf16.msra.mxu0 %v928_v18 }
  0x85   : > { %933 = vmatprep.subr.bf16.mxu0 %v932_v21 }
  0x88   : > { %935 = vmatpush3.bf16.msra.mxu0 %v932_v21 }
  0x89   : > { %937 = vmatprep.subr.bf16.mxu0 %v936_v24 }
  0x8c   : > { %939 = vmatpush3.bf16.msra.mxu0 %v936_v24 }
  0x8f   : > { %861 = vmatmul.mubr.f32.vlgmr.msra.gmra.mrb[0].mxu0 %v234_v25 }
  0x90   : > { %863 = vmatprep.mubr.f32.mxu0 %v235_v26 }
  0x93   : > { %864 = vmatmul.mubr.f32.gmra.mrb[2].mxu0 %v236_v27 }
  0x94   : > { %866 = vmatprep.mubr.f32.mxu0 %v237_v28 }
  0x97   : > { %867 = vmatmul.mubr.f32.gmra.mrb[4].mxu0 %v238_v29 }
  0x98   : > { %869 = vmatprep.mubr.f32.mxu0 %v239_v30 }
  0x9b   : > { %870 = vmatmul.mubr.f32.gmra.mrb[6].mxu0 %v240_v31 }
  0x9c   : > { %872 = vmatprep.mubr.f32.mxu0 %v241_v32 }
  0x9f   : > { %873 = vmatmul.mubr.f32.gmra.mrb[8].mxu0 %v242_v33 }
  0xa0   : > { %875 = vmatprep.mubr.f32.mxu0 %v243_v34 }
  0xa3   : > { %876 = vmatmul.mubr.f32.gmra.mrb[10].mxu0 %v244_v35 }
  0xa4   : > { %878 = vmatprep.mubr.f32.mxu0 %v245_v36 }
  0xa7   : > { %879 = vmatmul.mubr.f32.gmra.mrb[12].mxu0 %v246_v37 }
  0xa8   : > { %881 = vmatprep.mubr.f32.mxu0 %v247_v38 }
  0xab   : > { %882 = vmatmul.mubr.f32.gmra.mrb[14].mxu0 %v248_v39 }
  0xac   : > { %884 = vmatprep.mubr.f32.mxu0 %v249_v40 }
  0xaf   : > { %885 = vmatmul.mubr.f32.gmra.mrb[16].mxu0 %v250_v41 }
  0xb0   : > { %887 = vmatprep.mubr.f32.mxu0 %v251_v42 }
  0xb3   : > { %888 = vmatmul.mubr.f32.gmra.mrb[18].mxu0 %v252_v43 }
  0xb4   : > { %890 = vmatprep.mubr.f32.mxu0 %v253_v44 }
  0xb7   : > { %891 = vmatmul.mubr.f32.gmra.mrb[20].mxu0 %v254_v45 }
  0xb8   : > { %893 = vmatprep.mubr.f32.mxu0 %v255_v46 }
  0xbb   : > { %894 = vmatmul.mubr.f32.gmra.mrb[22].mxu0 %v256_v47 }
  0xbc   : > { %896 = vmatprep.mubr.f32.mxu0 %v257_v48 }
  0xbf   : > { %897 = vmatmul.mubr.f32.gmra.mrb[24].mxu0 %v258_v49 }
  0xc0   : > { %899 = vmatprep.mubr.f32.mxu0 %v259_v50 }
  0xc3   : > { %900 = vmatmul.mubr.f32.gmra.mrb[26].mxu0 %v260_v51 }
  0xc4   : > { %902 = vmatprep.mubr.f32.mxu0 %v261_v52 }
  0xc7   : > { %903 = vmatmul.mubr.f32.gmra.mrb[28].mxu0 %v262_v53 }
  0xc8   : > { %905 = vmatprep.mubr.f32.mxu0 %v263_v54 }
  0xcb   : > { %906 = vmatmul.mubr.f32.gmra.mrb[30].mxu0 %v264_v55 }
 0x162   : > { %v862_v57 = vpop.f32.mrb[0].mxu0 }
 0x163   : > { %v507_v58 = vmul.f32 %v862_v57, %v862_v57  ;;  %v347_v59 = vpop.f32.mrb[1].mxu0 }
 0x164   : > { %v506_v60 = vmul.f32 %v347_v59, %v347_v59 }
 0x166   : > { %v865_v61 = vpop.f32.mrb[2].mxu0  ;;  %v942_v62 = vpack.c.bf16 %v507_v58, %v506_v60 }
 0x167   : > { %v509_v63 = vmul.f32 %v865_v61, %v865_v61  ;;  %v357_v0 = vpop.f32.mrb[3].mxu0 }
 0x168   : > { %v508_v1 = vmul.f32 %v357_v0, %v357_v0 }
 0x16a   : > { %v946_v2 = vpack.c.bf16 %v509_v63, %v508_v1  ;;  %v868_v3 = vpop.f32.mrb[4].mxu0 }
 0x16b   : > { %v511_v4 = vmul.f32 %v868_v3, %v868_v3  ;;  %v367_v5 = vpop.f32.mrb[5].mxu0 }
 0x16c   : > { %v510_v6 = vmul.f32 %v367_v5, %v367_v5 }
 0x16e   : > { %v950_v7 = vpack.c.bf16 %v511_v4, %v510_v6  ;;  %v871_v8 = vpop.f32.mrb[6].mxu0 }
 0x16f   : > { %v513_v9 = vmul.f32 %v871_v8, %v871_v8  ;;  %v377_v10 = vpop.f32.mrb[7].mxu0 }
 0x170   : > { %v512_v11 = vmul.f32 %v377_v10, %v377_v10 }
 0x172   : > { %v954_v12 = vpack.c.bf16 %v513_v9, %v512_v11  ;;  %v874_v13 = vpop.f32.mrb[8].mxu0  ;;  %v538_v9 = vld [vmem:[#allocation7] sm:$0xff] }
 0x173   : > { %v515_v14 = vmul.f32 %v874_v13, %v874_v13  ;;  %v387_v15 = vpop.f32.mrb[9].mxu0 }
 0x174   : > { %v514_v16 = vmul.f32 %v387_v15, %v387_v15 }
 0x176   : > { %v958_v17 = vpack.c.bf16 %v515_v14, %v514_v16  ;;  %v877_v18 = vpop.f32.mrb[10].mxu0 }
 0x177   : > { %v517_v19 = vmul.f32 %v877_v18, %v877_v18  ;;  %v397_v20 = vpop.f32.mrb[11].mxu0 }
 0x178   : > { %v516_v21 = vmul.f32 %v397_v20, %v397_v20 }
 0x17a   : > { %v962_v22 = vpack.c.bf16 %v517_v19, %v516_v21  ;;  %v880_v23 = vpop.f32.mrb[12].mxu0 }
 0x17b   : > { %v519_v24 = vmul.f32 %v880_v23, %v880_v23  ;;  %v407_v25 = vpop.f32.mrb[13].mxu0 }
 0x17c   : > { %v518_v26 = vmul.f32 %v407_v25, %v407_v25 }
 0x17e   : > { %v966_v27 = vpack.c.bf16 %v519_v24, %v518_v26  ;;  %v883_v28 = vpop.f32.mrb[14].mxu0 }
 0x17f   : > { %v521_v29 = vmul.f32 %v883_v28, %v883_v28  ;;  %v417_v30 = vpop.f32.mrb[15].mxu0 }
 0x180   : > { %v520_v31 = vmul.f32 %v417_v30, %v417_v30 }
 0x182   : > { %v970_v32 = vpack.c.bf16 %v521_v29, %v520_v31  ;;  %v886_v33 = vpop.f32.mrb[16].mxu0 }
 0x183   : > { %v523_v34 = vmul.f32 %v886_v33, %v886_v33  ;;  %v427_v35 = vpop.f32.mrb[17].mxu0 }
 0x184   : > { %v522_v36 = vmul.f32 %v427_v35, %v427_v35 }
 0x186   : > { %v889_v37 = vpop.f32.mrb[18].mxu0  ;;  %v940_v38 = vpack.c.bf16 %v523_v34, %v522_v36 }
 0x187   : > { %v525_v39 = vmul.f32 %v889_v37, %v889_v37  ;;  %v437_v40 = vpop.f32.mrb[19].mxu0 }
 0x188   : > { %v524_v41 = vmul.f32 %v437_v40, %v437_v40  ;;  %941 = vmatprep.subr.bf16.mxu1 %v940_v38 }
 0x189   : > { %943 = vmatpush3.bf16.msra.mxu1 %v942_v62 }
 0x18a   : > { %v944_v42 = vpack.c.bf16 %v525_v39, %v524_v41  ;;  %v892_v43 = vpop.f32.mrb[20].mxu0 }
 0x18b   : > { %v527_v44 = vmul.f32 %v892_v43, %v892_v43  ;;  %v447_v45 = vpop.f32.mrb[21].mxu0 }
 0x18c   : > { %v526_v46 = vmul.f32 %v447_v45, %v447_v45  ;;  %945 = vmatprep.subr.bf16.mxu1 %v944_v42 }
 0x18d   : > { %947 = vmatpush3.bf16.msra.mxu1 %v946_v2 }
 0x18e   : > { %v948_v47 = vpack.c.bf16 %v527_v44, %v526_v46  ;;  %v895_v48 = vpop.f32.mrb[22].mxu0 }
 0x18f   : > { %v529_v49 = vmul.f32 %v895_v48, %v895_v48  ;;  %v457_v50 = vpop.f32.mrb[23].mxu0 }
 0x190   : > { %v528_v51 = vmul.f32 %v457_v50, %v457_v50  ;;  %949 = vmatprep.subr.bf16.mxu1 %v948_v47 }
 0x191   : > { %951 = vmatpush3.bf16.msra.mxu1 %v950_v7 }
 0x192   : > { %v952_v52 = vpack.c.bf16 %v529_v49, %v528_v51  ;;  %v898_v53 = vpop.f32.mrb[24].mxu0 }
 0x193   : > { %v531_v54 = vmul.f32 %v898_v53, %v898_v53  ;;  %v467_v55 = vpop.f32.mrb[25].mxu0 }
 0x194   : > { %v530_v56 = vmul.f32 %v467_v55, %v467_v55  ;;  %953 = vmatprep.subr.bf16.mxu1 %v952_v52 }
 0x195   : > { %955 = vmatpush3.bf16.msra.mxu1 %v954_v12 }
 0x196   : > { %v956_v57 = vpack.c.bf16 %v531_v54, %v530_v56  ;;  %v901_v58 = vpop.f32.mrb[26].mxu0 }
 0x197   : > { %v533_v59 = vmul.f32 %v901_v58, %v901_v58  ;;  %v477_v60 = vpop.f32.mrb[27].mxu0 }
 0x198   : > { %v532_v61 = vmul.f32 %v477_v60, %v477_v60  ;;  %957 = vmatprep.subr.bf16.mxu1 %v956_v57 }
 0x199   : > { %959 = vmatpush3.bf16.msra.mxu1 %v958_v17 }
 0x19a   : > { %v960_v62 = vpack.c.bf16 %v533_v59, %v532_v61  ;;  %v904_v63 = vpop.f32.mrb[28].mxu0 }
 0x19b   : > { %v535_v0 = vmul.f32 %v904_v63, %v904_v63  ;;  %v487_v1 = vpop.f32.mrb[29].mxu0 }
 0x19c   : > { %v534_v2 = vmul.f32 %v487_v1, %v487_v1  ;;  %961 = vmatprep.subr.bf16.mxu1 %v960_v62 }
 0x19d   : > { %963 = vmatpush3.bf16.msra.mxu1 %v962_v22 }
 0x19e   : > { %v964_v3 = vpack.c.bf16 %v535_v0, %v534_v2  ;;  %v907_v4 = vpop.f32.mrb[30].mxu0 }
 0x19f   : > { %v537_v5 = vmul.f32 %v907_v4, %v907_v4  ;;  %v497_v6 = vpop.f32.mrb[31].mxu0 }
 0x1a0   : > { %v536_v7 = vmul.f32 %v497_v6, %v497_v6  ;;  %965 = vmatprep.subr.bf16.mxu1 %v964_v3 }
 0x1a1   : > { %967 = vmatpush3.bf16.msra.mxu1 %v966_v27 }
 0x1a2   : > { %v968_v8 = vpack.c.bf16 %v537_v5, %v536_v7 }
 0x1a4   : > { %969 = vmatprep.subr.bf16.mxu1 %v968_v8 }
 0x1a5   : > { %971 = vmatpush3.bf16.msra.mxu1 %v970_v32 }
 0x1a8   : > { %605 = vmatmul.mubr.f32.vlgmr.msra.gmra.mrb[0].mxu1 %v538_v9 }
 0x27b   : > { %v825_v10 = vpop.f32.mrb[0].mxu1 }
 0x27c   : > { %v826_v11 = vpop.f32.mrb[1].mxu1 }
 0x27d   : > { %v827_v12 = vadd.f32 %v826_v11, %v825_v10 }
 0x27f   : > { %610 = vst [vmem:[%s232_s24] sm:$0xff] %v827_v12 }
 0x280   : > { %1156 = shalt.err (!%p1153_p11)
}
 0x281   : > { %s1157_s28 = scalar_lea.hbm %s1486_s26, 128  ;;  %s1161_s4 = scalar_lea.hbm %s1538_s3, 256 }
 0x282   : > { %p1158_p0 = scmp.ne.s32.totalorder %s1486_s26, %s1157_s28  ;;  %p1162_p6 = scmp.lt.u32.totalorder %s1486_s26, %s1538_s3 }
 0x283   : > { %p1163_p7 = scmp.lt.u32.totalorder %s1161_s4, %s1157_s28  ;;  %p1165_p8 = scmp.lt.u32.totalorder %s1157_s28, %s1486_s26 }
 0x284   : > { %p1159_p4 = pnand %p1158_p0, %p1553_p12 }
 0x285   : > { %p1164_p2 = por %p1163_p7, %p1162_p6 }
 0x286   : > { %p1160_p13 = pneg %p1159_p4 }
 0x287   : > { %p1166_p1 = por %p1165_p8, %p1164_p2 }
 0x289   : > { %p1167_p10 = pnand %p1166_p1, %p1160_p13 }
 0x28b   : > { %1170 = shalt.err (!%p1167_p10)
}
 0x28c   : > { %982 = dma.vmem_to_hbm [thread:$0]  (%p1553_p12), %s1488_s11, 128, %s1486_s26, %s612_s9  }
 0x28d PF: > { %s638_s20 = sand.u32 1, %s1209_s12   ;;  %p1554_p3 = scmp.ne.s32.totalorder %s1546_s23, 0 }
 0x28e   : > { %p1555_p5 = scmp.ge.s32.totalorder %s1229_s17, 2  ;;  %s639_s22 = scalar_lea.sflag [#allocation4], %s638_s20 }
 0x290   : > { %p996_p9 = pnand %p1555_p5, %p1554_p3 }
 0x292   : > { %1204 = dma.done.wait (!%p996_p9), %s639_s22, 128  }
 0x293   : > { %1206 = vsyncadd (!%p996_p9), %s639_s22, 4294967168  ;;  %s20_s17 = sadd.s32 1, %s1229_s17   ;;  %s1556_s12 = smov %s1213_s13 }
 0x294   : > { %p17_p11 = scmp.ge.s32.totalorder %s20_s17, 4   ;;  %s1557_s13 = smov %s1217_s14 }
 0x295   : > { %s1558_s14 = smov %s1402_s5  ;;  %s1559_s15 = smov %s1225_s16 }
 0x296   : > { %s1560_s16 = smov %s1562_s19  ;;  %19 = sbr.rel (!%p17_p11) target bundleno = 7 (0x7), region = 85 }
 0x29d   :  { %644 = vsyncpa [#allocation3], 1 }
 0x29e   :  { %646 = vsyncpa [#allocation3 + $0x1], 1 }
 0x29f   :  { %647 = vsyncpa [#allocation6], 1 }
 0x2a0   :  { %648 = vsyncpa [#allocation4], 1 }
 0x2a1   :  { %650 = vsyncpa [#allocation4 + $0x1], 1 }

</bundles_post_ra>
